<compile_context>
chip_gen: v7x
topology: tpu7x:2x2x1
jax: 0.10.0
libtpu: 0.0.40
codegen_flags: <defaults>
</compile_context>

<pallas_src>
import numpy as np
import jax
import jax.numpy as jnp
from jax import lax
from jax.experimental import pallas as pl
from jax.experimental.pallas import tpu as pltpu

NF = 8          # nf
N_LAYERS = 4    # n_layers
H_STEP = 0.5    # h; hamiltonian step = t_end / n_layers = (h * n_layers) / n_layers = h
N_CLASSES = 10
NOUT_PAD = 16   # classes padded 10 -> 16 sublanes
LANE = 128


def net_kernel(x_ref, At_ref, bconv_ref, Kt_ref, bham_ref, JKh_ref,
               fcw_ref, fcb_ref, out_ref):
    """One batch tile of the fused Net.forward, feature-major orientation.

    x_ref    : (bt, HW)       flattened images (lane-dense along HW)
    At_ref   : (NF, HW)       folded conv weights^T (tap masks * w / HW), x.dtype
    bconv_ref: (NF, 1)        conv bias (column)
    Kt_ref   : (L, NF, NF)    K_j^T
    bham_ref : (L, NF, 1)     b_j (column)
    JKh_ref  : (L, NF, NF)    h * (J @ K_j)
    fcw_ref  : (16, NF)       fc weights, rows >= 10 zero
    fcb_ref  : (16, 1)        fc bias, rows >= 10 set to -1e30
    out_ref  : (16, bt)       transposed padded log-softmax output
    """
    # ---- conv1 + spatial mean folded into ONE matmul, computed transposed:
    #      Yt = At @ x^T  (contract HW dims; no explicit transpose of x). ----
    Yt = lax.dot_general(
        At_ref[...], x_ref[...],
        dimension_numbers=(((1,), (1,)), ((), ())),
        preferred_element_type=jnp.float32) + bconv_ref[...]          # (NF, bt) f32

    # ---- H1 Hamiltonian layers (J1):  Yt += h*(J K_j) @ tanh(K_j^T Yt + b_j) ----
    for j in range(N_LAYERS):
        Zt = jnp.tanh(jnp.dot(Kt_ref[j], Yt, preferred_element_type=jnp.float32)
                      + bham_ref[j])
        Yt = Yt + jnp.dot(JKh_ref[j], Zt, preferred_element_type=jnp.float32)

    # ---- fc_end + log_softmax over classes (sublane axis).
    #      Padded class rows carry -1e30 bias -> exp underflows to 0. ----
    logits = jnp.dot(fcw_ref[...], Yt,
                     preferred_element_type=jnp.float32) + fcb_ref[...]  # (16, bt)
    m = jnp.max(logits, axis=0, keepdims=True)
    shifted = logits - m
    lse = jnp.log(jnp.sum(jnp.exp(shifted), axis=0, keepdims=True))
    out_ref[...] = shifted - lse


def _round_up(n, m):
    return ((n + m - 1) // m) * m


def _conv_fold_matrix_t(conv_w, H, W):
    """(NF, H*W) matrix At s.t. mean_spatial(conv_pad1(x)) = At @ x_flat^T (+ bias).

    For tap t=(ky,kx), the spatial sum of the shifted (zero-padded) window is
    the sum of x over a sub-rectangle; M[t] is that rectangle's 0/1 mask.
    """
    HW = H * W
    M = np.zeros((9, HW), np.float32)
    t = 0
    for ky in range(3):
        r0, r1 = max(0, ky - 1), min(H, ky + H - 1)
        for kx in range(3):
            c0, c1 = max(0, kx - 1), min(W, kx + W - 1)
            m2 = np.zeros((H, W), np.float32)
            m2[r0:r1, c0:c1] = 1.0
            M[t] = m2.reshape(-1)
            t += 1
    w = conv_w.reshape(NF, 9).astype(jnp.float32)            # tap order ky*3+kx
    return jnp.dot(w, jnp.asarray(M),
                   precision=lax.Precision.HIGHEST) / float(HW)      # (NF, HW)


def net_forward(x, params, b_tile=4096):
    B, C, H, W = x.shape
    assert C == 1, "Net expects single-channel input (MNIST-like)."
    assert b_tile % LANE == 0, "batch tile must be a multiple of 128"
    HW = H * W
    # No pad / dtype cast of x here (keeps HBM traffic at one read of x).
    x_flat = x.reshape(B, HW)
    assert x_flat.dtype in (jnp.float32, jnp.bfloat16)

    # Batch tiling: lane-dense batch tiles, ragged last block (no jnp.pad of x).
    # For B >= 256 force >= 2 grid steps so v7x megacore shards across both TCs.
    target = _round_up(-(-B // 2), 1) if B >= 256 else B
    bt = min(b_tile, _round_up(target, LANE))
    grid_n = -(-B // bt)
    b_out = grid_n * bt          # padded output columns (tiny; sliced off below)

    # Parameter-only preprocessing (done once, outside the kernel).
    hi = lax.Precision.HIGHEST
    At = _conv_fold_matrix_t(params["conv_w"], H, W).astype(x_flat.dtype)  # (NF, HW)
    bconv = params["conv_b"].reshape(NF, 1).astype(jnp.float32)
    K = params["K"].astype(jnp.float32)                                    # (L, NF, NF)
    Kt = jnp.transpose(K, (0, 2, 1))
    bham = jnp.transpose(params["b_ham"].astype(jnp.float32), (0, 2, 1))   # (L, NF, 1)
    J = params["J"].astype(jnp.float32)
    JKh = H_STEP * jnp.einsum("ab,lbc->lac", J, K, precision=hi)           # h*(J K_j)
    fcw = jnp.zeros((NOUT_PAD, NF), jnp.float32).at[:N_CLASSES].set(
        params["fc_w"].astype(jnp.float32))
    fcb = jnp.full((NOUT_PAD, 1), -1e30, jnp.float32).at[:N_CLASSES, 0].set(
        params["fc_b"].astype(jnp.float32))

    # VMEM budget: double-buffered x / out blocks + params, with headroom.
    x_blk = bt * HW * x_flat.dtype.itemsize
    out_blk = NOUT_PAD * bt * 4
    param_b = NF * HW * At.dtype.itemsize + 4 * (
        NF + 2 * N_LAYERS * NF * NF + N_LAYERS * NF + NOUT_PAD * NF + NOUT_PAD)
    vmem_limit = int(min(max(2 * (x_blk + out_blk + param_b) + (4 << 20),
                             32 << 20), 112 << 20))

    out_t = pl.pallas_call(
        net_kernel,
        out_shape=jax.ShapeDtypeStruct((NOUT_PAD, b_out), jnp.float32),
        grid=(grid_n,),
        in_specs=[
            pl.BlockSpec((bt, HW), lambda i: (i, 0)),                 # x tile (ragged ok)
            pl.BlockSpec((NF, HW), lambda i: (0, 0)),                 # folded conv^T
            pl.BlockSpec((NF, 1), lambda i: (0, 0)),                  # conv bias
            pl.BlockSpec((N_LAYERS, NF, NF), lambda i: (0, 0, 0)),    # K^T
            pl.BlockSpec((N_LAYERS, NF, 1), lambda i: (0, 0, 0)),     # b_ham
            pl.BlockSpec((N_LAYERS, NF, NF), lambda i: (0, 0, 0)),    # h*(J K)
            pl.BlockSpec((NOUT_PAD, NF), lambda i: (0, 0)),           # fc_w padded
            pl.BlockSpec((NOUT_PAD, 1), lambda i: (0, 0)),            # fc_b padded
        ],
        out_specs=pl.BlockSpec((NOUT_PAD, bt), lambda i: (0, i)),
        compiler_params=pltpu.CompilerParams(
            dimension_semantics=("parallel",),
            vmem_limit_bytes=vmem_limit),
    )(x_flat, At, bconv, Kt, bham, JKh, fcw, fcb)
    # Valid classes / valid batch only (pad rows hold -1e30, pad cols hold
    # results of unspecified boundary rows -- never reduced over, just dropped).
    return out_t[:N_CLASSES, :B].T


def init_params(key):
    # Deterministic synthetic init (module __init__ only defines shapes).
    ks = jax.random.split(key, 6)
    half = NF // 2
    eye = jnp.eye(half, dtype=jnp.float32)
    zeros = jnp.zeros((half, half), jnp.float32)
    J1 = jnp.block([[zeros, -eye], [eye, zeros]])            # J1 symplectic matrix
    return {
        "conv_w": jax.random.normal(ks[0], (NF, 1, 3, 3), jnp.float32) * 0.3,
        "conv_b": jax.random.normal(ks[1], (NF,), jnp.float32) * 0.1,
        "K": jax.random.normal(ks[2], (N_LAYERS, NF, NF), jnp.float32) * 0.3,
        "b_ham": jax.random.normal(ks[3], (N_LAYERS, 1, NF), jnp.float32) * 0.1,
        "J": J1,
        "fc_w": jax.random.normal(ks[4], (N_CLASSES, NF), jnp.float32) * 0.3,
        "fc_b": jax.random.normal(ks[5], (N_CLASSES,), jnp.float32) * 0.1,
    }


def net_reference(x, params):
    # Pure-JAX reference mirroring the PyTorch forward (for correctness check).
    hi = lax.Precision.HIGHEST
    out = lax.conv_general_dilated(
        x, params["conv_w"], window_strides=(1, 1), padding=((1, 1), (1, 1)),
        dimension_numbers=("NCHW", "OIHW", "NCHW"), precision=hi)
    out = out + params["conv_b"][None, :, None, None]
    B = x.shape[0]
    Y = out.reshape(B, NF, -1).mean(axis=2)                  # (B, nf)
    J = params["J"]
    for j in range(N_LAYERS):
        Kj = params["K"][j]
        bj = params["b_ham"][j]
        Z = jnp.tanh(jnp.dot(Y, Kj, precision=hi) + bj)
        Y = Y + H_STEP * jnp.dot(Z, jnp.dot(J, Kj, precision=hi).T, precision=hi)
    logits = jnp.dot(Y, params["fc_w"].T, precision=hi) + params["fc_b"][None, :]
    return jax.nn.log_softmax(logits, axis=1)


if __name__ == "__main__":
    key = jax.random.PRNGKey(0)
    kx, kp = jax.random.split(key)
    params = init_params(kp)

    # Small MNIST-like input: batch=2, channels=1, spatial=16.
    x = jax.random.normal(kx, (2, 1, 16, 16), jnp.float32)
    out = jax.block_until_ready(net_forward(x, params))
    assert out.shape == (2, N_CLASSES) and out.dtype == jnp.float32
    ref = net_reference(x, params)
    np.testing.assert_allclose(np.asarray(out), np.asarray(ref),
                               rtol=1e-4, atol=1e-4)

    # Multi-step grid + ragged last block (no jnp.pad of x anywhere).
    xb = jax.random.normal(jax.random.PRNGKey(1), (300, 1, 16, 16), jnp.float32)
    refb = net_reference(xb, params)
    outb = jax.block_until_ready(net_forward(xb, params, b_tile=128))
    np.testing.assert_allclose(np.asarray(outb), np.asarray(refb),
                               rtol=1e-4, atol=1e-4)

    # bf16 input path (production should produce bf16 upstream in the data
    # pipeline; the astype here is only to exercise the kernel's bf16 path).
    xh = xb.astype(jnp.bfloat16)
    outh = jax.block_until_ready(net_forward(xh, params, b_tile=128))
    np.testing.assert_allclose(np.asarray(outh), np.asarray(refb),
                               rtol=5e-2, atol=5e-2)

    print("KERNEL_OK")
</pallas_src>

<mosaic_0001>
module attributes {stable_mosaic.version = 11 : i64} {
  func.func @net_kernel(%arg0: i32, %arg1: memref<128x256xf32, #tpu.memory_space<vmem>>, %arg2: memref<8x256xf32, #tpu.memory_space<vmem>>, %arg3: memref<8x1xf32, #tpu.memory_space<vmem>>, %arg4: memref<4x8x8xf32, #tpu.memory_space<vmem>>, %arg5: memref<4x8x1xf32, #tpu.memory_space<vmem>>, %arg6: memref<4x8x8xf32, #tpu.memory_space<vmem>>, %arg7: memref<16x8xf32, #tpu.memory_space<vmem>>, %arg8: memref<16x1xf32, #tpu.memory_space<vmem>>, %arg9: memref<16x128xf32, #tpu.memory_space<vmem>>) attributes {dimension_semantics = [#tpu.dimension_semantics<parallel>], iteration_bounds = array<i64: 1>, scalar_prefetch = 0 : i64, scratch_operands = 0 : i64, tpu.core_type = #tpu.core_type<tc>, window_params = [{transform_indices = @transform_0, window_bounds = array<i64: 128, 256>}, {pipeline_mode = #tpu.pipeline_mode<synchronous>, transform_indices = @transform_1, window_bounds = array<i64: 8, 256>}, {pipeline_mode = #tpu.pipeline_mode<synchronous>, transform_indices = @transform_2, window_bounds = array<i64: 8, 1>}, {pipeline_mode = #tpu.pipeline_mode<synchronous>, transform_indices = @transform_3, window_bounds = array<i64: 4, 8, 8>}, {pipeline_mode = #tpu.pipeline_mode<synchronous>, transform_indices = @transform_4, window_bounds = array<i64: 4, 8, 1>}, {pipeline_mode = #tpu.pipeline_mode<synchronous>, transform_indices = @transform_5, window_bounds = array<i64: 4, 8, 8>}, {pipeline_mode = #tpu.pipeline_mode<synchronous>, transform_indices = @transform_6, window_bounds = array<i64: 16, 8>}, {pipeline_mode = #tpu.pipeline_mode<synchronous>, transform_indices = @transform_7, window_bounds = array<i64: 16, 1>}, {transform_indices = @transform_8, window_bounds = array<i64: 16, 128>}]} {
    %c0 = arith.constant 0 : index
    %c0_0 = arith.constant 0 : index
    %0 = vector.load %arg2[%c0, %c0_0] : memref<8x256xf32, #tpu.memory_space<vmem>>, vector<8x256xf32>
    %c0_1 = arith.constant 0 : index
    %c0_2 = arith.constant 0 : index
    %1 = vector.load %arg1[%c0_1, %c0_2] : memref<128x256xf32, #tpu.memory_space<vmem>>, vector<128x256xf32>
    %cst = arith.constant dense<0.000000e+00> : vector<8x128xf32>
    %2 = tpu.matmul %0, %1, %cst {dimension_numbers = #tpu.dot_dimension_numbers<[1], [1], [0], [0], [0, 0, 1, 0], [], []>} : vector<8x256xf32>, vector<128x256xf32>, vector<8x128xf32> -> vector<8x128xf32>
    %c0_3 = arith.constant 0 : index
    %c0_4 = arith.constant 0 : index
    %3 = vector.load %arg3[%c0_3, %c0_4] : memref<8x1xf32, #tpu.memory_space<vmem>>, vector<8x1xf32>
    %4 = vector.broadcast %3 : vector<8x1xf32> to vector<8x128xf32>
    %5 = arith.addf %2, %4 : vector<8x128xf32>
    %c0_5 = arith.constant 0 : index
    %c0_6 = arith.constant 0 : index
    %c0_7 = arith.constant 0 : index
    %6 = vector.load %arg4[%c0_5, %c0_6, %c0_7] : memref<4x8x8xf32, #tpu.memory_space<vmem>>, vector<1x8x8xf32>
    %7 = vector.shape_cast %6 : vector<1x8x8xf32> to vector<8x8xf32>
    %cst_8 = arith.constant dense<0.000000e+00> : vector<8x128xf32>
    %8 = tpu.matmul %7, %5, %cst_8 {dimension_numbers = #tpu.dot_dimension_numbers<[1], [0], [0], [1], [0, 0, 1, 1], [], []>} : vector<8x8xf32>, vector<8x128xf32>, vector<8x128xf32> -> vector<8x128xf32>
    %c0_9 = arith.constant 0 : index
    %c0_10 = arith.constant 0 : index
    %c0_11 = arith.constant 0 : index
    %9 = vector.load %arg5[%c0_9, %c0_10, %c0_11] : memref<4x8x1xf32, #tpu.memory_space<vmem>>, vector<1x8x1xf32>
    %10 = vector.shape_cast %9 : vector<1x8x1xf32> to vector<8x1xf32>
    %11 = vector.broadcast %10 : vector<8x1xf32> to vector<8x128xf32>
    %12 = arith.addf %8, %11 : vector<8x128xf32>
    %13 = math.tanh %12 : vector<8x128xf32>
    %c0_12 = arith.constant 0 : index
    %c0_13 = arith.constant 0 : index
    %c0_14 = arith.constant 0 : index
    %14 = vector.load %arg6[%c0_12, %c0_13, %c0_14] : memref<4x8x8xf32, #tpu.memory_space<vmem>>, vector<1x8x8xf32>
    %15 = vector.shape_cast %14 : vector<1x8x8xf32> to vector<8x8xf32>
    %cst_15 = arith.constant dense<0.000000e+00> : vector<8x128xf32>
    %16 = tpu.matmul %15, %13, %cst_15 {dimension_numbers = #tpu.dot_dimension_numbers<[1], [0], [0], [1], [0, 0, 1, 1], [], []>} : vector<8x8xf32>, vector<8x128xf32>, vector<8x128xf32> -> vector<8x128xf32>
    %17 = arith.addf %5, %16 : vector<8x128xf32>
    %c1 = arith.constant 1 : index
    %c0_16 = arith.constant 0 : index
    %c0_17 = arith.constant 0 : index
    %18 = vector.load %arg4[%c1, %c0_16, %c0_17] : memref<4x8x8xf32, #tpu.memory_space<vmem>>, vector<1x8x8xf32>
    %19 = vector.shape_cast %18 : vector<1x8x8xf32> to vector<8x8xf32>
    %cst_18 = arith.constant dense<0.000000e+00> : vector<8x128xf32>
    %20 = tpu.matmul %19, %17, %cst_18 {dimension_numbers = #tpu.dot_dimension_numbers<[1], [0], [0], [1], [0, 0, 1, 1], [], []>} : vector<8x8xf32>, vector<8x128xf32>, vector<8x128xf32> -> vector<8x128xf32>
    %c1_19 = arith.constant 1 : index
    %c0_20 = arith.constant 0 : index
    %c0_21 = arith.constant 0 : index
    %21 = vector.load %arg5[%c1_19, %c0_20, %c0_21] : memref<4x8x1xf32, #tpu.memory_space<vmem>>, vector<1x8x1xf32>
    %22 = vector.shape_cast %21 : vector<1x8x1xf32> to vector<8x1xf32>
    %23 = vector.broadcast %22 : vector<8x1xf32> to vector<8x128xf32>
    %24 = arith.addf %20, %23 : vector<8x128xf32>
    %25 = math.tanh %24 : vector<8x128xf32>
    %c1_22 = arith.constant 1 : index
    %c0_23 = arith.constant 0 : index
    %c0_24 = arith.constant 0 : index
    %26 = vector.load %arg6[%c1_22, %c0_23, %c0_24] : memref<4x8x8xf32, #tpu.memory_space<vmem>>, vector<1x8x8xf32>
    %27 = vector.shape_cast %26 : vector<1x8x8xf32> to vector<8x8xf32>
    %cst_25 = arith.constant dense<0.000000e+00> : vector<8x128xf32>
    %28 = tpu.matmul %27, %25, %cst_25 {dimension_numbers = #tpu.dot_dimension_numbers<[1], [0], [0], [1], [0, 0, 1, 1], [], []>} : vector<8x8xf32>, vector<8x128xf32>, vector<8x128xf32> -> vector<8x128xf32>
    %29 = arith.addf %17, %28 : vector<8x128xf32>
    %c2 = arith.constant 2 : index
    %c0_26 = arith.constant 0 : index
    %c0_27 = arith.constant 0 : index
    %30 = vector.load %arg4[%c2, %c0_26, %c0_27] : memref<4x8x8xf32, #tpu.memory_space<vmem>>, vector<1x8x8xf32>
    %31 = vector.shape_cast %30 : vector<1x8x8xf32> to vector<8x8xf32>
    %cst_28 = arith.constant dense<0.000000e+00> : vector<8x128xf32>
    %32 = tpu.matmul %31, %29, %cst_28 {dimension_numbers = #tpu.dot_dimension_numbers<[1], [0], [0], [1], [0, 0, 1, 1], [], []>} : vector<8x8xf32>, vector<8x128xf32>, vector<8x128xf32> -> vector<8x128xf32>
    %c2_29 = arith.constant 2 : index
    %c0_30 = arith.constant 0 : index
    %c0_31 = arith.constant 0 : index
    %33 = vector.load %arg5[%c2_29, %c0_30, %c0_31] : memref<4x8x1xf32, #tpu.memory_space<vmem>>, vector<1x8x1xf32>
    %34 = vector.shape_cast %33 : vector<1x8x1xf32> to vector<8x1xf32>
    %35 = vector.broadcast %34 : vector<8x1xf32> to vector<8x128xf32>
    %36 = arith.addf %32, %35 : vector<8x128xf32>
    %37 = math.tanh %36 : vector<8x128xf32>
    %c2_32 = arith.constant 2 : index
    %c0_33 = arith.constant 0 : index
    %c0_34 = arith.constant 0 : index
    %38 = vector.load %arg6[%c2_32, %c0_33, %c0_34] : memref<4x8x8xf32, #tpu.memory_space<vmem>>, vector<1x8x8xf32>
    %39 = vector.shape_cast %38 : vector<1x8x8xf32> to vector<8x8xf32>
    %cst_35 = arith.constant dense<0.000000e+00> : vector<8x128xf32>
    %40 = tpu.matmul %39, %37, %cst_35 {dimension_numbers = #tpu.dot_dimension_numbers<[1], [0], [0], [1], [0, 0, 1, 1], [], []>} : vector<8x8xf32>, vector<8x128xf32>, vector<8x128xf32> -> vector<8x128xf32>
    %41 = arith.addf %29, %40 : vector<8x128xf32>
    %c3 = arith.constant 3 : index
    %c0_36 = arith.constant 0 : index
    %c0_37 = arith.constant 0 : index
    %42 = vector.load %arg4[%c3, %c0_36, %c0_37] : memref<4x8x8xf32, #tpu.memory_space<vmem>>, vector<1x8x8xf32>
    %43 = vector.shape_cast %42 : vector<1x8x8xf32> to vector<8x8xf32>
    %cst_38 = arith.constant dense<0.000000e+00> : vector<8x128xf32>
    %44 = tpu.matmul %43, %41, %cst_38 {dimension_numbers = #tpu.dot_dimension_numbers<[1], [0], [0], [1], [0, 0, 1, 1], [], []>} : vector<8x8xf32>, vector<8x128xf32>, vector<8x128xf32> -> vector<8x128xf32>
    %c3_39 = arith.constant 3 : index
    %c0_40 = arith.constant 0 : index
    %c0_41 = arith.constant 0 : index
    %45 = vector.load %arg5[%c3_39, %c0_40, %c0_41] : memref<4x8x1xf32, #tpu.memory_space<vmem>>, vector<1x8x1xf32>
    %46 = vector.shape_cast %45 : vector<1x8x1xf32> to vector<8x1xf32>
    %47 = vector.broadcast %46 : vector<8x1xf32> to vector<8x128xf32>
    %48 = arith.addf %44, %47 : vector<8x128xf32>
    %49 = math.tanh %48 : vector<8x128xf32>
    %c3_42 = arith.constant 3 : index
    %c0_43 = arith.constant 0 : index
    %c0_44 = arith.constant 0 : index
    %50 = vector.load %arg6[%c3_42, %c0_43, %c0_44] : memref<4x8x8xf32, #tpu.memory_space<vmem>>, vector<1x8x8xf32>
    %51 = vector.shape_cast %50 : vector<1x8x8xf32> to vector<8x8xf32>
    %cst_45 = arith.constant dense<0.000000e+00> : vector<8x128xf32>
    %52 = tpu.matmul %51, %49, %cst_45 {dimension_numbers = #tpu.dot_dimension_numbers<[1], [0], [0], [1], [0, 0, 1, 1], [], []>} : vector<8x8xf32>, vector<8x128xf32>, vector<8x128xf32> -> vector<8x128xf32>
    %53 = arith.addf %41, %52 : vector<8x128xf32>
    %c0_46 = arith.constant 0 : index
    %c0_47 = arith.constant 0 : index
    %54 = vector.load %arg7[%c0_46, %c0_47] : memref<16x8xf32, #tpu.memory_space<vmem>>, vector<16x8xf32>
    %cst_48 = arith.constant dense<0.000000e+00> : vector<16x128xf32>
    %55 = tpu.matmul %54, %53, %cst_48 {dimension_numbers = #tpu.dot_dimension_numbers<[1], [0], [0], [1], [0, 0, 1, 1], [], []>} : vector<16x8xf32>, vector<8x128xf32>, vector<16x128xf32> -> vector<16x128xf32>
    %c0_49 = arith.constant 0 : index
    %c0_50 = arith.constant 0 : index
    %56 = vector.load %arg8[%c0_49, %c0_50] : memref<16x1xf32, #tpu.memory_space<vmem>>, vector<16x1xf32>
    %57 = vector.broadcast %56 : vector<16x1xf32> to vector<16x128xf32>
    %58 = arith.addf %55, %57 : vector<16x128xf32>
    %cst_51 = arith.constant dense<0xFF800000> : vector<128xf32>
    %59 = vector.multi_reduction <maximumf>, %58, %cst_51 [0] : vector<16x128xf32> to vector<128xf32>
    %60 = vector.shape_cast %59 : vector<128xf32> to vector<1x128xf32>
    %61 = vector.broadcast %60 : vector<1x128xf32> to vector<16x128xf32>
    %62 = arith.subf %58, %61 : vector<16x128xf32>
    %63 = math.exp %62 : vector<16x128xf32>
    %cst_52 = arith.constant dense<0.000000e+00> : vector<128xf32>
    %64 = vector.multi_reduction <add>, %63, %cst_52 [0] : vector<16x128xf32> to vector<128xf32>
    %65 = vector.shape_cast %64 : vector<128xf32> to vector<1x128xf32>
    %66 = math.log %65 : vector<1x128xf32>
    %67 = vector.broadcast %66 : vector<1x128xf32> to vector<16x128xf32>
    %68 = arith.subf %62, %67 : vector<16x128xf32>
    %c0_53 = arith.constant 0 : index
    %c0_54 = arith.constant 0 : index
    %69 = vector.load %arg9[%c0_53, %c0_54] : memref<16x128xf32, #tpu.memory_space<vmem>>, vector<16x128xf32>
    tpu.vector_store %arg9[%c0_53, %c0_54], %68 {strides = array<i32>} : memref<16x128xf32, #tpu.memory_space<vmem>>, vector<16x128xf32>,
    return
  }
  func.func @transform_0(%arg0: i32) -> (i32, i32) {
    %c0_i32 = arith.constant 0 : i32
    %c0_i32_0 = arith.constant 0 : i32
    return %arg0, %c0_i32 : i32, i32
  }
  func.func @transform_1(%arg0: i32) -> (i32, i32) {
    %c0_i32 = arith.constant 0 : i32
    %c0_i32_0 = arith.constant 0 : i32
    %c0_i32_1 = arith.constant 0 : i32
    return %c0_i32, %c0_i32_0 : i32, i32
  }
  func.func @transform_2(%arg0: i32) -> (i32, i32) {
    %c0_i32 = arith.constant 0 : i32
    %c0_i32_0 = arith.constant 0 : i32
    %c0_i32_1 = arith.constant 0 : i32
    return %c0_i32, %c0_i32_0 : i32, i32
  }
  func.func @transform_3(%arg0: i32) -> (i32, i32, i32) {
    %c0_i32 = arith.constant 0 : i32
    %c0_i32_0 = arith.constant 0 : i32
    %c0_i32_1 = arith.constant 0 : i32
    %c0_i32_2 = arith.constant 0 : i32
    return %c0_i32, %c0_i32_0, %c0_i32_1 : i32, i32, i32
  }
  func.func @transform_4(%arg0: i32) -> (i32, i32, i32) {
    %c0_i32 = arith.constant 0 : i32
    %c0_i32_0 = arith.constant 0 : i32
    %c0_i32_1 = arith.constant 0 : i32
    %c0_i32_2 = arith.constant 0 : i32
    return %c0_i32, %c0_i32_0, %c0_i32_1 : i32, i32, i32
  }
  func.func @transform_5(%arg0: i32) -> (i32, i32, i32) {
    %c0_i32 = arith.constant 0 : i32
    %c0_i32_0 = arith.constant 0 : i32
    %c0_i32_1 = arith.constant 0 : i32
    %c0_i32_2 = arith.constant 0 : i32
    return %c0_i32, %c0_i32_0, %c0_i32_1 : i32, i32, i32
  }
  func.func @transform_6(%arg0: i32) -> (i32, i32) {
    %c0_i32 = arith.constant 0 : i32
    %c0_i32_0 = arith.constant 0 : i32
    %c0_i32_1 = arith.constant 0 : i32
    return %c0_i32, %c0_i32_0 : i32, i32
  }
  func.func @transform_7(%arg0: i32) -> (i32, i32) {
    %c0_i32 = arith.constant 0 : i32
    %c0_i32_0 = arith.constant 0 : i32
    %c0_i32_1 = arith.constant 0 : i32
    return %c0_i32, %c0_i32_0 : i32, i32
  }
  func.func @transform_8(%arg0: i32) -> (i32, i32) {
    %c0_i32 = arith.constant 0 : i32
    %c0_i32_0 = arith.constant 0 : i32
    return %c0_i32, %arg0 : i32, i32
  }
}

</mosaic_0001>

<bundles_post_ra>
// kernel: tpu_custom_call.1
= control target key start
LH: loop header
LB: loop body
LE: loop exit
PB: predicated region body
PF: predicated region fallthrough
CT: control target
= control target key end

     0   :  { %13 = vsyncpa [#allocation3], 0  ;;  %s1764_s0 = inlined_call_operand.hbm [shape: f32[2,256], index: 0, kind: input, shape index: {}]   ;;  %s1765_s1 = inlined_call_operand.vmem [shape: f32[8,256], index: 1, kind: input, shape index: {}]   ;;  %s1766_s2 = inlined_call_operand.vmem [shape: f32[8,1], index: 2, kind: input, shape index: {}]   ;;  %s1767_s3 = inlined_call_operand.vmem [shape: f32[4,8,8], index: 3, kind: input, shape index: {}]   ;;  %s1768_s4 = inlined_call_operand.vmem [shape: f32[4,8,1], index: 4, kind: input, shape index: {}]   ;;  %s1769_s5 = inlined_call_operand.vmem [shape: f32[4,8,8], index: 5, kind: input, shape index: {}]   ;;  %s1770_s6 = inlined_call_operand.vmem [shape: f32[16,8], index: 6, kind: input, shape index: {}]   ;;  %s1771_s7 = inlined_call_operand.vmem [shape: f32[16,1], index: 7, kind: input, shape index: {}]   ;;  %s1772_s8 = inlined_call_operand.hbm [shape: f32[16,128], index: 8, kind: output, shape index: {}]  }
   0x1   :  { %14 = vsyncpa [#allocation4], 0 }
   0x2   :  { %19 = vsyncadd [#allocation3], 4032  ;;  %s1595_s27 = smov [#allocation2]   ;;  %s1547_s9 = scalar_lea.hbm %s1764_s0, 64 }
   0x3   :  { %s20_s28 = sshll.u32 %s1595_s27, 4  ;;  %p1548_p0 = scmp.ne.s32.totalorder %s1764_s0, %s1547_s9  ;;  %s21_s28 = int_to_ptr.vmem [resolvable:$true] %s20_s28 }
   0x4   :  { %p1551_p1 = scmp.lt.u32.totalorder %s1547_s9, %s1764_s0 }
   0x6   :  { %p1553_p2 = pnand %p1551_p1, %p1548_p0 }
   0x8   :  { %1556 = shalt.err (!%p1553_p2)
}
   0x9   :  { %s1557_s14 = scalar_lea.vmem %s21_s28, 64  ;;  %s1561_s15 = scalar_lea.vmem %s21_s28, 4096 }
   0xa   :  { %p1558_p3 = scmp.ne.s32.totalorder %s21_s28, %s1557_s14  ;;  %p1562_p4 = scmp.lt.s32.totalorder %s21_s28, %s21_s28 }
   0xb   :  { %p1563_p5 = scmp.lt.s32.totalorder %s1561_s15, %s1557_s14 }
   0xd   :  { %p1564_p6 = por %p1563_p5, %p1562_p4 }
   0xf   :  { %p1565_p7 = pnand %p1564_p6, %p1558_p3 }
  0x11   :  { %1568 = shalt.err (!%p1565_p7)
}
  0x12   :  { %s1596_s16 = smov 64   ;;  %s1597_s17 = smov 4  }
  0x13   :  { %26 = dma.hbm_to_vmem [thread:$0]  %s1764_s0, 64, %s21_s28, [#allocation3], %s1596_s16, %s1596_s16, %s1597_s17  }
  0x14   :  { %1591 = dma.done.wait [#allocation3], 4096  }
  0x15   :  { %1592 = vsyncadd [#allocation3], 4294963200  ;;  %v1598_v0 = vmov 0   ;;  %v1515_v1 = vld.sshfl [vmem:[#allocation2] sm:$0xff pattern:$0x76325410] }
  0x16   :  { %1467 = vset.pattern.permute.xlu0 %v1598_v0  ;;  %1468 = vset.pattern.permute.xlu1 %v1598_v0  ;;  %v1516_v2 = vld.sshfl [vmem:[#allocation2 + $0x8] sm:$0xff pattern:$0x76325410]  ;;  %v1517_v3 = vld.sshfl [vmem:[#allocation2 + $0x10] sm:$0xff pattern:$0x76325410] }
  0x17   :  { %v1518_v4 = vld.sshfl [vmem:[#allocation2 + $0x18] sm:$0xff pattern:$0x76325410]  ;;  %v1519_v5 = vld.sshfl [vmem:[#allocation2 + $0x20] sm:$0xff pattern:$0x76325410]  ;;  %v197_v6 = vcombine.high %v1515_v1, %v1516_v2  ;;  %v196_v8 = vcombine.low %v1515_v1, %v1516_v2 }
  0x18   :  { %v215_v7 = vcombine.high %v1517_v3, %v1518_v4  ;;  %v214_v9 = vcombine.low %v1517_v3, %v1518_v4  ;;  %v1520_v10 = vld.sshfl [vmem:[#allocation2 + $0x28] sm:$0xff pattern:$0x76325410]  ;;  %v1521_v11 = vld.sshfl [vmem:[#allocation2 + $0x30] sm:$0xff pattern:$0x76325410] }
  0x19   :  { %v1522_v12 = vld.sshfl [vmem:[#allocation2 + $0x38] sm:$0xff pattern:$0x76325410]  ;;  %v1523_v15 = vld.sshfl [vmem:[#allocation2 + $0x40] sm:$0xff pattern:$0x76325410]  ;;  %v233_v16 = vcombine.high %v1519_v5, %v1520_v10  ;;  %v232_v21 = vcombine.low %v1519_v5, %v1520_v10 }
  0x1a   :  { %v1425_v13 = vpack.c.bf16 %v215_v7, %v197_v6  ;;  %v1427_v14 = vpack.c.bf16 %v214_v9, %v196_v8  ;;  %v1524_v17 = vld.sshfl [vmem:[#allocation2 + $0x48] sm:$0xff pattern:$0x76325410]  ;;  %v1525_v18 = vld.sshfl [vmem:[#allocation2 + $0x50] sm:$0xff pattern:$0x76325410]  ;;  %v251_v20 = vcombine.high %v1521_v11, %v1522_v12  ;;  %v250_v22 = vcombine.low %v1521_v11, %v1522_v12 }
  0x1b   :  { %v1526_v19 = vld.sshfl [vmem:[#allocation2 + $0x58] sm:$0xff pattern:$0x76325410]  ;;  %v1527_v24 = vld.sshfl [vmem:[#allocation2 + $0x60] sm:$0xff pattern:$0x76325410]  ;;  %v269_v25 = vcombine.high %v1523_v15, %v1524_v17  ;;  %v268_v36 = vcombine.low %v1523_v15, %v1524_v17 }
  0x1c   :  { %1426 = vmatprep.subr.bf16.mxu0 %v1425_v13  ;;  %v1429_v23 = vpack.c.bf16 %v251_v20, %v233_v16  ;;  %v287_v26 = vcombine.high %v1525_v18, %v1526_v19  ;;  %v1528_v27 = vld.sshfl [vmem:[#allocation2 + $0x68] sm:$0xff pattern:$0x76325410]  ;;  %v1529_v28 = vld.sshfl [vmem:[#allocation2 + $0x70] sm:$0xff pattern:$0x76325410]  ;;  %v1431_v30 = vpack.c.bf16 %v250_v22, %v232_v21  ;;  %v286_v37 = vcombine.low %v1525_v18, %v1526_v19 }
  0x1d   :  { %1428 = vmatpush1.bf16.xpose.msra.mxu0 %v1427_v14  ;;  %v1530_v29 = vld.sshfl [vmem:[#allocation2 + $0x78] sm:$0xff pattern:$0x76325410]  ;;  %v1531_v32 = vld.sshfl [vmem:[#allocation2 + $0x80] sm:$0xff pattern:$0x76325410]  ;;  %v305_v38 = vcombine.high %v1527_v24, %v1528_v27  ;;  %v304_v46 = vcombine.low %v1527_v24, %v1528_v27 }
  0x1e   :  { %1430 = vmatprep.subr.bf16.mxu0 %v1429_v23  ;;  %v1433_v31 = vpack.c.bf16 %v287_v26, %v269_v25  ;;  %v1532_v33 = vld.sshfl [vmem:[#allocation2 + $0x88] sm:$0xff pattern:$0x76325410]  ;;  %v1533_v34 = vld.sshfl [vmem:[#allocation2 + $0x90] sm:$0xff pattern:$0x76325410]  ;;  %v323_v39 = vcombine.high %v1529_v28, %v1530_v29  ;;  %v1435_v40 = vpack.c.bf16 %v286_v37, %v268_v36  ;;  %v322_v47 = vcombine.low %v1529_v28, %v1530_v29 }
  0x1f   :  { %v1534_v35 = vld.sshfl [vmem:[#allocation2 + $0x98] sm:$0xff pattern:$0x76325410]  ;;  %v1535_v42 = vld.sshfl [vmem:[#allocation2 + $0xa0] sm:$0xff pattern:$0x76325410]  ;;  %v341_v48 = vcombine.high %v1531_v32, %v1532_v33  ;;  %v340_v55 = vcombine.low %v1531_v32, %v1532_v33 }
  0x20   :  { %v1437_v41 = vpack.c.bf16 %v323_v39, %v305_v38  ;;  %v1536_v43 = vld.sshfl [vmem:[#allocation2 + $0xa8] sm:$0xff pattern:$0x76325410]  ;;  %v1537_v44 = vld.sshfl [vmem:[#allocation2 + $0xb0] sm:$0xff pattern:$0x76325410]  ;;  %v359_v49 = vcombine.high %v1533_v34, %v1534_v35  ;;  %v1439_v50 = vpack.c.bf16 %v322_v47, %v304_v46  ;;  %v358_v56 = vcombine.low %v1533_v34, %v1534_v35 }
  0x21   :  { %v1538_v45 = vld.sshfl [vmem:[#allocation2 + $0xb8] sm:$0xff pattern:$0x76325410]  ;;  %v45_v51 = vld [vmem:[%s1765_s1 + $0x8] sm:$0xff]  ;;  %v110_v52 = vld [vmem:[%s1766_s2] sm:$0xff]  ;;  %v377_v58 = vcombine.high %v1535_v42, %v1536_v43  ;;  %v376_v3 = vcombine.low %v1535_v42, %v1536_v43  ;;  %v1599_v23 = vmov 0.0  }
  0x22   :  { %v1441_v53 = vpack.c.bf16 %v359_v49, %v341_v48  ;;  %564 = vmatprep.mubr.f32.mxu0 %v45_v51  ;;  %113 = vperm.xlu0 %1467, %v110_v52   ;;  %v571_v54 = vld [vmem:[%s1768_s4] sm:$0xff]  ;;  %v395_v59 = vcombine.high %v1537_v44, %v1538_v45  ;;  %v1540_v60 = vld.sshfl [vmem:[#allocation2 + $0xc8] sm:$0xff pattern:$0x76325410]  ;;  %v1355_v63 = vld [vmem:[%s1768_s4 + $0x18] sm:$0xff]  ;;  %v1443_v0 = vpack.c.bf16 %v358_v56, %v340_v55  ;;  %vm1600_vm0 = vmmov 0  }
  0x23   :  { %v1539_v57 = vld.sshfl [vmem:[#allocation2 + $0xc0] sm:$0xff pattern:$0x76325410]  ;;  %v1541_v61 = vld.sshfl [vmem:[#allocation2 + $0xd0] sm:$0xff pattern:$0x76325410]  ;;  %v394_v4 = vcombine.low %v1537_v44, %v1538_v45  ;;  %1380 = vmatprep.subr.mxu1 %v1599_v23  ;;  %1382 = vmatprep.mubr.msk.f32.mxu1 %vm1600_vm0, %v1599_v23 }
  0x24   :  { %v1542_v62 = vld.sshfl [vmem:[#allocation2 + $0xd8] sm:$0xff pattern:$0x76325410]  ;;  %v1445_v1 = vpack.c.bf16 %v395_v59, %v377_v58  ;;  %v1207_v2 = vld [vmem:[%s1771_s7 + $0x8] sm:$0xff]  ;;  %v413_v6 = vcombine.high %v1539_v57, %v1540_v60  ;;  %v412_v13 = vcombine.low %v1539_v57, %v1540_v60  ;;  %v44_v22 = vld [vmem:[%s1765_s1] sm:$0xff]  ;;  %vm577_vm1 = vcmask 64512  }
  0x25   :  { %1432 = vmatpush1.bf16.xpose.msra.mxu0 %v1431_v30  ;;  %v1543_v5 = vld.sshfl [vmem:[#allocation2 + $0xe0] sm:$0xff pattern:$0x76325410]  ;;  %v431_v7 = vcombine.high %v1541_v61, %v1542_v62  ;;  %v1544_v8 = vld.sshfl [vmem:[#allocation2 + $0xe8] sm:$0xff pattern:$0x76325410]  ;;  %v1447_v11 = vpack.c.bf16 %v394_v4, %v376_v3  ;;  %v430_v14 = vcombine.low %v1541_v61, %v1542_v62 }
  0x26   :  { %1434 = vmatprep.subr.bf16.mxu0 %v1433_v31  ;;  %574 = vperm.xlu0 %1467, %v571_v54   ;;  %v1545_v9 = vld.sshfl [vmem:[#allocation2 + $0xf0] sm:$0xff pattern:$0x76325410]  ;;  %v1546_v10 = vld.sshfl [vmem:[#allocation2 + $0xf8] sm:$0xff pattern:$0x76325410]  ;;  %v449_v15 = vcombine.high %v1543_v5, %v1544_v8  ;;  %v448_v19 = vcombine.low %v1543_v5, %v1544_v8 }
  0x27   :  { %v1449_v12 = vpack.c.bf16 %v431_v7, %v413_v6  ;;  %v467_v16 = vcombine.high %v1545_v9, %v1546_v10  ;;  %v1451_v17 = vpack.c.bf16 %v430_v14, %v412_v13  ;;  %v466_v20 = vcombine.low %v1545_v9, %v1546_v10  ;;  %v570_v28 = vld [vmem:[%s1767_s3] sm:$0xff]  ;;  %v1345_v35 = vld [vmem:[%s1768_s4 + $0x8] sm:$0xff]  ;;  %v1350_v36 = vld [vmem:[%s1768_s4 + $0x10] sm:$0xff] }
  0x28   :  { %v652_v33 = vld [vmem:[%s1769_s5] sm:$0xff]  ;;  %733 = vperm.xlu1 %1468, %v1345_v35   ;;  %v1347_v46 = vld [vmem:[%s1769_s5 + $0x8] sm:$0xff]  ;;  %v1349_v51 = vld [vmem:[%s1767_s3 + $0x10] sm:$0xff] }
  0x29   :  { %v1453_v18 = vpack.c.bf16 %v467_v16, %v449_v15  ;;  %v1455_v21 = vpack.c.bf16 %v466_v20, %v448_v19  ;;  %v1206_v37 = vld [vmem:[%s1771_s7] sm:$0xff]  ;;  %v1352_v56 = vld [vmem:[%s1769_s5 + $0x10] sm:$0xff]  ;;  %v1354_v61 = vld [vmem:[%s1767_s3 + $0x18] sm:$0xff] }
  0x2a   :  { %1051 = vperm.xlu0 %1467, %v1355_v63   ;;  %v1204_v4 = vld [vmem:[%s1770_s6] sm:$0xff]  ;;  %v1205_v8 = vld [vmem:[%s1770_s6 + $0x8] sm:$0xff] }
  0x2c   :  { %892 = vperm.xlu1 %1468, %v1350_v36  }
  0x2d   :  { %1436 = vmatpush1.bf16.xpose.msra.mxu0 %v1435_v40 }
  0x2e   :  { %1438 = vmatprep.subr.bf16.mxu0 %v1437_v41  ;;  %1215 = vperm.xlu0 %1467, %v1207_v2   ;;  %v1344_v41 = vld [vmem:[%s1767_s3 + $0x8] sm:$0xff]  ;;  %v1357_v2 = vld [vmem:[%s1769_s5 + $0x18] sm:$0xff]  ;;  %s1601_s5 = smov [#allocation5]  }
  0x2f   :  { %s1330_s6 = sshll.u32 %s1601_s5, 4  ;;  %s1331_s6 = int_to_ptr.vmem [resolvable:$true] %s1330_s6 }
  0x30   :  { %1210 = vperm.xlu1 %1468, %v1206_v37   ;;  %s1569_s28 = scalar_lea.vmem %s1331_s6, 256  ;;  %p1574_p9 = scmp.lt.s32.totalorder %s1331_s6, %s1331_s6 }
  0x31   :  { %p1570_p8 = scmp.ne.s32.totalorder %s1331_s6, %s1569_s28  ;;  %p1575_p10 = scmp.lt.s32.totalorder %s1569_s28, %s1569_s28 }
  0x33   :  { %p1576_p11 = por %p1575_p10, %p1574_p9 }
  0x35   :  { %1440 = vmatpush1.bf16.xpose.msra.mxu0 %v1439_v50  ;;  %p1577_p12 = pnand %p1576_p11, %p1570_p8 }
  0x36   :  { %1442 = vmatprep.subr.bf16.mxu0 %v1441_v53 }
  0x3d   :  { %1444 = vmatpush1.bf16.xpose.msra.mxu0 %v1443_v0 }
  0x3e   :  { %1446 = vmatprep.subr.bf16.mxu0 %v1445_v1 }
  0x45   :  { %1448 = vmatpush1.bf16.xpose.msra.mxu0 %v1447_v11 }
  0x46   :  { %1450 = vmatprep.subr.bf16.mxu0 %v1449_v12 }
  0x4d   :  { %1452 = vmatpush1.bf16.xpose.msra.mxu0 %v1451_v17 }
  0x4e   :  { %1454 = vmatprep.subr.bf16.mxu0 %v1453_v18 }
  0x55   :  { %1456 = vmatpush1.bf16.xpose.msra.mxu0 %v1455_v21 }
  0x5c   :  { %565 = vmatmul.mubr.f32.vlgmr.msra.gmra.mrb[0].mxu0 %v44_v22 }
  0xa1   :  { %v114_v24 = vpop.permute.xlu0 %113 }
  0xa5   :  { %v575_v29 = vpop.permute.xlu0 %574 }
  0xa7   :  { %v734_v42 = vpop.permute.xlu1 %733 }
  0xa9   :  { %v1052_v62 = vpop.permute.xlu0 %1051 }
  0xab   :  { %v893_v52 = vpop.permute.xlu1 %892 }
  0xad   :  { %v1216_v9 = vpop.permute.xlu0 %1215 }
  0xaf   :  { %v1211_v11 = vpop.permute.xlu1 %1210 }
 0x12f   :  { %v566_v25 = vpop.f32.mrb[0].mxu0 }
 0x130   :  { %v567_v26 = vadd.f32 %v566_v25, %v114_v24  ;;  %v568_v27 = vpop.f32.mrb[1].mxu0 }
 0x132   :  { %1381 = vmatpush3.msra.mxu1 %v567_v26 }
 0x133   :  { %1383 = vmatmul.mubr.msk.f32.vlgmr.msra.gmra.mrb[0].mxu1 %vm577_vm1, %v570_v28  ;;  %1385 = vmatprep.subr.mxu1 %v1599_v23 }
 0x134   :  { %1387 = vmatprep.mubr.msk.f32.mxu1 %vm1600_vm0, %v1599_v23 }
 0x206   :  { %v647_v30 = vpop.f32.mrb[0].mxu1 }
 0x207   :  { %v648_v31 = vadd.f32 %v647_v30, %v575_v29  ;;  %v1384_v32 = vpop.f32.mrb[1].mxu1 }
 0x209   :  { %1501 = vtanh.f32 %v648_v31 }
 0x213   :  { %v1502_v34 = vpop.eup %1501 }
 0x214   :  { %1386 = vmatpush3.msra.mxu1 %v1502_v34 }
 0x215   :  { %1388 = vmatmul.mubr.msk.f32.vlgmr.msra.gmra.mrb[2].mxu1 %vm577_vm1, %v652_v33  ;;  %1390 = vmatprep.subr.mxu1 %v1599_v23 }
 0x216   :  { %1392 = vmatprep.mubr.msk.f32.mxu1 %vm1600_vm0, %v1599_v23 }
 0x2e8   :  { %v722_v38 = vpop.f32.mrb[2].mxu1 }
 0x2e9   :  { %v726_v39 = vadd.f32 %v722_v38, %v567_v26  ;;  %v1389_v40 = vpop.f32.mrb[3].mxu1 }
 0x2eb   :  { %1391 = vmatpush3.msra.mxu1 %v726_v39 }
 0x2ec   :  { %1393 = vmatmul.mubr.msk.f32.vlgmr.msra.gmra.mrb[4].mxu1 %vm577_vm1, %v1344_v41  ;;  %1395 = vmatprep.subr.mxu1 %v1599_v23 }
 0x2ed   :  { %1397 = vmatprep.mubr.msk.f32.mxu1 %vm1600_vm0, %v1599_v23 }
 0x3bf   :  { %v805_v43 = vpop.f32.mrb[4].mxu1 }
 0x3c0   :  { %v806_v44 = vadd.f32 %v805_v43, %v734_v42  ;;  %v1394_v45 = vpop.f32.mrb[5].mxu1 }
 0x3c2   :  { %1503 = vtanh.f32 %v806_v44 }
 0x3cc   :  { %v1504_v47 = vpop.eup %1503 }
 0x3cd   :  { %1396 = vmatpush3.msra.mxu1 %v1504_v47 }
 0x3ce   :  { %1398 = vmatmul.mubr.msk.f32.vlgmr.msra.gmra.mrb[6].mxu1 %vm577_vm1, %v1347_v46  ;;  %1400 = vmatprep.subr.mxu1 %v1599_v23 }
 0x3cf   :  { %1402 = vmatprep.mubr.msk.f32.mxu1 %vm1600_vm0, %v1599_v23 }
 0x4a1   :  { %v881_v48 = vpop.f32.mrb[6].mxu1 }
 0x4a2   :  { %v885_v49 = vadd.f32 %v881_v48, %v726_v39  ;;  %v1399_v50 = vpop.f32.mrb[7].mxu1 }
 0x4a4   :  { %1401 = vmatpush3.msra.mxu1 %v885_v49 }
 0x4a5   :  { %1403 = vmatmul.mubr.msk.f32.vlgmr.msra.gmra.mrb[8].mxu1 %vm577_vm1, %v1349_v51  ;;  %1405 = vmatprep.subr.mxu1 %v1599_v23 }
 0x4a6   :  { %1407 = vmatprep.mubr.msk.f32.mxu1 %vm1600_vm0, %v1599_v23 }
 0x578   :  { %v964_v53 = vpop.f32.mrb[8].mxu1 }
 0x579   :  { %v965_v54 = vadd.f32 %v964_v53, %v893_v52  ;;  %v1404_v55 = vpop.f32.mrb[9].mxu1 }
 0x57b   :  { %1505 = vtanh.f32 %v965_v54 }
 0x585   :  { %v1506_v57 = vpop.eup %1505 }
 0x586   :  { %1406 = vmatpush3.msra.mxu1 %v1506_v57 }
 0x587   :  { %1408 = vmatmul.mubr.msk.f32.vlgmr.msra.gmra.mrb[10].mxu1 %vm577_vm1, %v1352_v56  ;;  %1410 = vmatprep.subr.mxu1 %v1599_v23 }
 0x588   :  { %1412 = vmatprep.mubr.msk.f32.mxu1 %vm1600_vm0, %v1599_v23 }
 0x65a   :  { %v1040_v58 = vpop.f32.mrb[10].mxu1 }
 0x65b   :  { %v1044_v59 = vadd.f32 %v1040_v58, %v885_v49  ;;  %v1409_v60 = vpop.f32.mrb[11].mxu1 }
 0x65d   :  { %1411 = vmatpush3.msra.mxu1 %v1044_v59 }
 0x65e   :  { %1413 = vmatmul.mubr.msk.f32.vlgmr.msra.gmra.mrb[12].mxu1 %vm577_vm1, %v1354_v61  ;;  %1415 = vmatprep.subr.mxu1 %v1599_v23 }
 0x65f   :  { %1417 = vmatprep.mubr.msk.f32.mxu1 %vm1600_vm0, %v1599_v23 }
 0x731   :  { %v1123_v63 = vpop.f32.mrb[12].mxu1 }
 0x732   :  { %v1124_v0 = vadd.f32 %v1123_v63, %v1052_v62  ;;  %v1414_v1 = vpop.f32.mrb[13].mxu1 }
 0x734   :  { %1507 = vtanh.f32 %v1124_v0 }
 0x73e   :  { %v1508_v3 = vpop.eup %1507 }
 0x73f   :  { %1416 = vmatpush3.msra.mxu1 %v1508_v3 }
 0x740   :  { %1418 = vmatmul.mubr.msk.f32.vlgmr.msra.gmra.mrb[14].mxu1 %vm577_vm1, %v1357_v2 }
 0x741   :  { %1422 = vmatprep.mubr.msk.f32.mxu1 %vm577_vm1, %v1204_v4 }
 0x813   :  { %v1199_v5 = vpop.f32.mrb[14].mxu1 }
 0x814   :  { %v1203_v6 = vadd.f32 %v1199_v5, %v1044_v59  ;;  %v1419_v7 = vpop.f32.mrb[15].mxu1 }
 0x816   :  { %1420 = vmatprep.subr.mxu1 %v1203_v6 }
 0x817   :  { %1421 = vmatpush3.msra.mxu1 %v1203_v6 }
 0x818   :  { %1423 = vmatmul.mubr.msk.f32.vlgmr.msra.gmra.mrb[16].mxu1 %vm577_vm1, %v1205_v8 }
 0x8eb   :  { %v1424_v10 = vpop.f32.mrb[16].mxu1 }
 0x8ec   :  { %v1296_v12 = vadd.f32 %v1424_v10, %v1216_v9  ;;  %v1290_v13 = vpop.f32.mrb[17].mxu1 }
 0x8ed   :  { %v1291_v14 = vadd.f32 %v1290_v13, %v1211_v11 }
 0x8ef   :  { %v1299_v15 = vmax.f32 %v1291_v14, %v1296_v12 }
 0x8f1   :  { %v1300_v16 = vrot.slane %v1299_v15, 4 }
 0x8f3   :  { %v1301_v17 = vmax.f32 %v1299_v15, %v1300_v16 }
 0x8f5   :  { %v1302_v18 = vrot.slane %v1301_v17, 2 }
 0x8f7   :  { %v1303_v19 = vmax.f32 %v1301_v17, %v1302_v18 }
 0x8f9   :  { %v1304_v20 = vrot.slane %v1303_v19, 1 }
 0x8fb   :  { %v1305_v21 = vmax.f32 %v1303_v19, %v1304_v20 }
 0x8fd   :  { %v1306_v22 = vsub.f32 %v1291_v14, %v1305_v21  ;;  %v1307_v23 = vsub.f32 %v1296_v12, %v1305_v21 }
 0x8ff   :  { %v1308_v24 = vmul.f32 1.442695, %v1306_v22  ;;  %v1310_v25 = vmul.f32 1.442695, %v1307_v23 }
 0x901   :  { %1509 = vpow2.f32 %v1308_v24 }
 0x902   :  { %1511 = vpow2.f32 %v1310_v25 }
 0x90b   :  { %v1510_v26 = vpop.eup %1509 }
 0x90c   :  { %v1512_v27 = vpop.eup %1511 }
 0x90d   :  { %v1312_v28 = vadd.f32 %v1512_v27, %v1510_v26 }
 0x90f   :  { %v1313_v29 = vrot.slane %v1312_v28, 4 }
 0x911   :  { %v1314_v30 = vadd.f32 %v1313_v29, %v1312_v28 }
 0x913   :  { %v1315_v31 = vrot.slane %v1314_v30, 2 }
 0x915   :  { %v1316_v32 = vadd.f32 %v1315_v31, %v1314_v30 }
 0x917   :  { %v1317_v33 = vrot.slane %v1316_v32, 1 }
 0x919   :  { %v1318_v34 = vadd.f32 %v1317_v33, %v1316_v32 }
 0x91b   :  { %1513 = vlog2.f32 %v1318_v34 }
 0x925   :  { %v1514_v35 = vpop.eup %1513 }
 0x926   :  { %v1320_v36 = vmul.f32 0.6931472, %v1514_v35 }
 0x928   :  { %v1321_v37 = vsub.f32 %v1306_v22, %v1320_v36  ;;  %v1322_v38 = vsub.f32 %v1307_v23, %v1320_v36 }
 0x92a   :  { %1323 = vst [vmem:[#allocation5] sm:$0xff] %v1321_v37  ;;  %1324 = vst [vmem:[#allocation5 + $0x8] sm:$0xff] %v1322_v38 }
 0x92b   :  { %1580 = shalt.err (!%p1577_p12)
}
 0x92c   :  { %s1581_s9 = scalar_lea.hbm %s1772_s8, 256 }
 0x92d   :  { %p1582_p13 = scmp.ne.s32.totalorder %s1772_s8, %s1581_s9  ;;  %p1585_p0 = scmp.lt.u32.totalorder %s1581_s9, %s1772_s8 }
 0x92f   :  { %p1587_p1 = pnand %p1585_p0, %p1582_p13 }
 0x931   :  { %1590 = shalt.err (!%p1587_p1)
}
 0x932   :  { %s1602_s13 = smov 128   ;;  %s1603_s14 = smov 8  }
 0x933   :  { %1336 = dma.vmem_to_hbm [thread:$0]  %s1331_s6, 256, %s1772_s8, [#allocation4], %s1602_s13, %s1602_s13, %s1603_s14  }
 0x934   :  { %1593 = dma.done.wait [#allocation4], 256  }
 0x935   :  { %1594 = vsyncadd [#allocation4], 4294967040 }
 0x936   :  { %1340 = vsyncpa [#allocation3], 1 }
 0x937   :  { %1341 = vsyncpa [#allocation4], 1 }

</bundles_post_ra>
